<compile_context>
chip_gen: v7x
topology: tpu7x:2x2x1
jax: 0.10.0
libtpu: 0.0.40
codegen_flags: <defaults>
</compile_context>

<pallas_src>
import functools
import math

import jax
import jax.numpy as jnp
from jax.experimental import pallas as pl
from jax.experimental.pallas import tpu as pltpu


LANES = 128


def _round_up(x, m):
    return (x + m - 1) // m * m


def _rollout_kernel(x_ref, h0_ref, w_ref, b_ref, out_ref, h_scr, *, H, INp):
    t = pl.program_id(0)

    # Initialize the VMEM-carried hidden state on the first step only.
    @pl.when(t == 0)
    def _():
        h_scr[...] = h0_ref[...]

    x = x_ref[0]                              # (Bp, INp): [x_t | 1 | 0-pad]
    h = h_scr[...]                            # (Bp, H)

    # Static slices of the resident weight slab.
    w1 = w_ref[0:INp, 0:H]                    # fc1 weights, bias in the "ones" row
    wg = w_ref[INp:INp + 2 * H, :]            # fused GRU gate weights (2H, 4H<=128)
    wo = w_ref[INp + 2 * H:INp + 3 * H, :]    # [I_H | fc2^T | fc3^T | 0]
    bg = b_ref[:, 0:LANES]                    # pre-broadcast GRU biases (Bp, 128)
    bo = b_ref[:, LANES:2 * LANES]            # pre-broadcast head biases (Bp, 128)

    # fc1 + ReLU (bias folded via the constant-1 input lane).
    y = jnp.maximum(jnp.dot(x, w1, preferred_element_type=jnp.float32), 0.0)

    # Fused GRU gate matmul: [y | h] @ (2H, 4H) -> [rz_pre | gi_n | gh_n].
    yh = jnp.concatenate([y, h], axis=-1)                                  # (Bp, 2H)
    g = jnp.dot(yh, wg, preferred_element_type=jnp.float32) + bg           # (Bp, 128)

    rz = jax.nn.sigmoid(g[:, 0:2 * H])
    r = rz[:, 0:H]
    z = rz[:, H:2 * H]
    n = jnp.tanh(g[:, 2 * H:3 * H] + r * g[:, 3 * H:4 * H])
    h_new = (1.0 - z) * n + z * h
    h_scr[...] = h_new

    # Identity-augmented heads matmul -> lane-dense slab [h_new | pi | q | 0].
    out_ref[0] = jnp.dot(h_new, wo, preferred_element_type=jnp.float32) + bo


def pack_params(params, input_shape, rnn_hidden_dim, n_actions):
    """Transpose / fuse / pack all parameters ONCE (reused across all steps)."""
    H, A, IN = rnn_hidden_dim, n_actions, input_shape
    f32 = jnp.float32
    assert 4 * H <= LANES, "fused GRU lane layout requires 4*H <= 128"
    assert H + A + 1 <= LANES, "output slab layout requires H + A + 1 <= 128"
    INp = _round_up(IN + 1, 8)

    w1t = jnp.asarray(params["fc1_w"], f32).T          # (IN, H)
    wih = jnp.asarray(params["gru_w_ih"], f32)          # (3H, H) rows [r|z|n]
    whh = jnp.asarray(params["gru_w_hh"], f32)          # (3H, H)
    b_ih = jnp.asarray(params["gru_b_ih"], f32)
    b_hh = jnp.asarray(params["gru_b_hh"], f32)

    R = INp + 3 * H
    wslab = jnp.zeros((R, LANES), f32)
    # fc1 block; the constant-1 input lane picks up the bias row.
    wslab = wslab.at[0:IN, 0:H].set(w1t)
    wslab = wslab.at[IN, 0:H].set(jnp.asarray(params["fc1_b"], f32))
    # Fused GRU block: LHS = [y | h], output cols [r | z | n_i | n_h].
    r0 = INp
    wslab = wslab.at[r0:r0 + H, 0:H].set(wih[0:H].T)
    wslab = wslab.at[r0:r0 + H, H:2 * H].set(wih[H:2 * H].T)
    wslab = wslab.at[r0:r0 + H, 2 * H:3 * H].set(wih[2 * H:3 * H].T)
    wslab = wslab.at[r0 + H:r0 + 2 * H, 0:H].set(whh[0:H].T)
    wslab = wslab.at[r0 + H:r0 + 2 * H, H:2 * H].set(whh[H:2 * H].T)
    wslab = wslab.at[r0 + H:r0 + 2 * H, 3 * H:4 * H].set(whh[2 * H:3 * H].T)
    # Identity-augmented heads block -> [h_new | pi | q | 0].
    r1 = INp + 2 * H
    wslab = wslab.at[r1:r1 + H, 0:H].set(jnp.eye(H, dtype=f32))
    wslab = wslab.at[r1:r1 + H, H:H + A].set(jnp.asarray(params["fc2_w"], f32).T)
    wslab = wslab.at[r1:r1 + H, H + A:H + A + 1].set(jnp.asarray(params["fc3_w"], f32).T)

    # Bias rows: lanes [0:128] GRU ([b_rz_sum | b_in | b_hn]); lanes [128:256] heads.
    bias_rows = jnp.zeros((1, 2 * LANES), f32)
    bias_rows = bias_rows.at[0, 0:H].set(b_ih[0:H] + b_hh[0:H])
    bias_rows = bias_rows.at[0, H:2 * H].set(b_ih[H:2 * H] + b_hh[H:2 * H])
    bias_rows = bias_rows.at[0, 2 * H:3 * H].set(b_ih[2 * H:3 * H])
    bias_rows = bias_rows.at[0, 3 * H:4 * H].set(b_hh[2 * H:3 * H])
    bias_rows = bias_rows.at[0, LANES + H:LANES + H + A].set(jnp.asarray(params["fc2_b"], f32))
    bias_rows = bias_rows.at[0, LANES + H + A].set(jnp.asarray(params["fc3_b"], f32)[0])

    return wslab, bias_rows


@functools.partial(jax.jit, static_argnums=(3, 4))
def rnn_ppo_agent_rollout(xs, hidden_state, packed, rnn_hidden_dim, n_actions):
    """Run T GRU steps in one kernel.  xs: (T, B, input_shape)."""
    H, A = rnn_hidden_dim, n_actions
    wslab, bias_rows = packed
    T, B, IN = xs.shape
    INp = _round_up(IN + 1, 8)
    R = INp + 3 * H
    assert wslab.shape == (R, LANES)
    Bp = _round_up(max(B, 8), 8)

    # Pad once per rollout (not per step): inputs slab with a constant-1 bias lane.
    xs_p = jnp.zeros((T, Bp, INp), jnp.float32)
    xs_p = xs_p.at[:, :B, :IN].set(jnp.asarray(xs, jnp.float32))
    xs_p = xs_p.at[:, :, IN].set(1.0)

    h_in = jnp.asarray(hidden_state, jnp.float32).reshape(-1, H)
    if h_in.shape[0] == 1 and B > 1:
        h_in = jnp.broadcast_to(h_in, (B, H))
    h0_p = jnp.zeros((Bp, H), jnp.float32).at[:B, :].set(h_in)

    bias2 = jnp.broadcast_to(bias_rows, (Bp, 2 * LANES))

    kernel = functools.partial(_rollout_kernel, H=H, INp=INp)
    out = pl.pallas_call(
        kernel,
        grid=(T,),
        in_specs=[
            pl.BlockSpec((1, Bp, INp), lambda t: (t, 0, 0)),   # per-step input
            pl.BlockSpec((Bp, H), lambda t: (0, 0)),           # initial hidden (resident)
            pl.BlockSpec((R, LANES), lambda t: (0, 0)),        # weight slab (resident)
            pl.BlockSpec((Bp, 2 * LANES), lambda t: (0, 0)),   # bias slab (resident)
        ],
        out_specs=pl.BlockSpec((1, Bp, LANES), lambda t: (t, 0, 0)),
        out_shape=jax.ShapeDtypeStruct((T, Bp, LANES), jnp.float32),
        scratch_shapes=[pltpu.VMEM((Bp, H), jnp.float32)],     # carried hidden state
        compiler_params=pltpu.CompilerParams(
            dimension_semantics=("arbitrary",)),               # sequential recurrence
    )(xs_p, h0_p, wslab, bias2)

    hs = out[:, :B, 0:H]
    pis = out[:, :B, H:H + A]
    qs = out[:, :B, H + A:H + A + 1]
    return pis, qs, hs


@functools.partial(jax.jit, static_argnums=(3, 4))
def rnn_ppo_agent_forward(inputs, hidden_state, packed, rnn_hidden_dim, n_actions):
    """Single step, matching RNNPPOAgent.forward: returns (pi, q, h)."""
    pis, qs, hs = rnn_ppo_agent_rollout(inputs[None], hidden_state, packed,
                                        rnn_hidden_dim, n_actions)
    return pis[0], qs[0], hs[0]


def _init_params(key, input_shape, rnn_hidden_dim, n_actions):
    """Deterministic init mimicking PyTorch default uniform(-1/sqrt(fan_in), ...)."""
    H = rnn_hidden_dim
    keys = jax.random.split(key, 10)

    def u(k, shape, fan_in):
        bound = 1.0 / math.sqrt(fan_in)
        return jax.random.uniform(k, shape, jnp.float32, -bound, bound)

    return {
        "fc1_w": u(keys[0], (H, input_shape), input_shape),
        "fc1_b": u(keys[1], (H,), input_shape),
        "gru_w_ih": u(keys[2], (3 * H, H), H),
        "gru_w_hh": u(keys[3], (3 * H, H), H),
        "gru_b_ih": u(keys[4], (3 * H,), H),
        "gru_b_hh": u(keys[5], (3 * H,), H),
        "fc2_w": u(keys[6], (n_actions, H), H),
        "fc2_b": u(keys[7], (n_actions,), H),
        "fc3_w": u(keys[8], (1, H), H),
        "fc3_b": u(keys[9], (1,), H),
    }


def _reference_forward(inputs, hidden_state, params, H):
    """Pure-JAX reference (mirrors the PyTorch module) for the correctness check."""
    x = jax.nn.relu(inputs @ params["fc1_w"].T + params["fc1_b"])
    h = hidden_state.reshape(-1, H)
    gi = x @ params["gru_w_ih"].T + params["gru_b_ih"]
    gh = h @ params["gru_w_hh"].T + params["gru_b_hh"]
    r = jax.nn.sigmoid(gi[:, :H] + gh[:, :H])
    z = jax.nn.sigmoid(gi[:, H:2 * H] + gh[:, H:2 * H])
    n = jnp.tanh(gi[:, 2 * H:] + r * gh[:, 2 * H:])
    h_new = (1.0 - z) * n + z * h
    pi = h_new @ params["fc2_w"].T + params["fc2_b"]
    q = h_new @ params["fc3_w"].T + params["fc3_b"]
    return pi, q, h_new


if __name__ == "__main__":
    # Small, module-consistent shapes.
    batch = 4
    input_shape = 16       # obs feature dim
    rnn_hidden_dim = 32    # args.rnn_hidden_dim
    n_actions = 8          # args.n_actions
    T = 8                  # rollout length for the amortized kernel

    key = jax.random.PRNGKey(0)
    k_x, k_h, k_p = jax.random.split(key, 3)

    xs = jax.random.normal(k_x, (T, batch, input_shape), jnp.float32)
    hidden0 = jax.random.normal(k_h, (batch, rnn_hidden_dim), jnp.float32)
    params = _init_params(k_p, input_shape, rnn_hidden_dim, n_actions)

    # Pack / transpose / fuse weights ONCE; reuse across environment steps.
    packed = pack_params(params, input_shape, rnn_hidden_dim, n_actions)

    # --- single step (module forward semantics) ---
    pi, q, h = rnn_ppo_agent_forward(xs[0], hidden0, packed, rnn_hidden_dim, n_actions)
    jax.block_until_ready((pi, q, h))
    pi_ref, q_ref, h_ref = _reference_forward(xs[0], hidden0, params, rnn_hidden_dim)
    assert pi.shape == (batch, n_actions) and q.shape == (batch, 1) and h.shape == (batch, rnn_hidden_dim)
    assert jnp.allclose(pi, pi_ref, atol=1e-5, rtol=1e-5)
    assert jnp.allclose(q, q_ref, atol=1e-5, rtol=1e-5)
    assert jnp.allclose(h, h_ref, atol=1e-5, rtol=1e-5)

    # --- T-step rollout, time loop inside the kernel ---
    pis, qs, hs = rnn_ppo_agent_rollout(xs, hidden0, packed, rnn_hidden_dim, n_actions)
    jax.block_until_ready((pis, qs, hs))
    h_cur = hidden0
    for t in range(T):
        pi_r, q_r, h_cur = _reference_forward(xs[t], h_cur, params, rnn_hidden_dim)
        assert jnp.allclose(pis[t], pi_r, atol=1e-4, rtol=1e-4)
        assert jnp.allclose(qs[t], q_r, atol=1e-4, rtol=1e-4)
        assert jnp.allclose(hs[t], h_cur, atol=1e-4, rtol=1e-4)

    print("KERNEL_OK")
</pallas_src>

<mosaic_0001>
module attributes {stable_mosaic.version = 11 : i64} {
  func.func @_rollout_kernel(%arg0: i32, %arg1: memref<1x8x24xf32, #tpu.memory_space<vmem>>, %arg2: memref<8x32xf32, #tpu.memory_space<vmem>>, %arg3: memref<120x128xf32, #tpu.memory_space<vmem>>, %arg4: memref<8x256xf32, #tpu.memory_space<vmem>>, %arg5: memref<1x8x128xf32, #tpu.memory_space<vmem>>, %arg6: memref<8x32xf32, #tpu.memory_space<vmem>>) attributes {dimension_semantics = [#tpu.dimension_semantics<arbitrary>], iteration_bounds = array<i64: 1>, scalar_prefetch = 0 : i64, scratch_operands = 1 : i64, tpu.core_type = #tpu.core_type<tc>, window_params = [{transform_indices = @transform_0, window_bounds = array<i64: 1, 8, 24>}, {pipeline_mode = #tpu.pipeline_mode<synchronous>, transform_indices = @transform_1, window_bounds = array<i64: 8, 32>}, {pipeline_mode = #tpu.pipeline_mode<synchronous>, transform_indices = @transform_2, window_bounds = array<i64: 120, 128>}, {pipeline_mode = #tpu.pipeline_mode<synchronous>, transform_indices = @transform_3, window_bounds = array<i64: 8, 256>}, {transform_indices = @transform_4, window_bounds = array<i64: 1, 8, 128>}]} {
    %c0_i32 = arith.constant 0 : i32
    %0 = arith.cmpi eq, %arg0, %c0_i32 : i32
    %1 = arith.extui %0 : i1 to i32
    %c0_i32_0 = arith.constant 0 : i32
    %2 = arith.cmpi ne, %1, %c0_i32_0 : i32
    scf.if %2 {
      %c0_22 = arith.constant 0 : index
      %c0_23 = arith.constant 0 : index
      %41 = vector.load %arg2[%c0_22, %c0_23] : memref<8x32xf32, #tpu.memory_space<vmem>>, vector<8x32xf32>
      %c0_24 = arith.constant 0 : index
      %c0_25 = arith.constant 0 : index
      %42 = vector.load %arg6[%c0_24, %c0_25] : memref<8x32xf32, #tpu.memory_space<vmem>>, vector<8x32xf32>
      tpu.vector_store %arg6[%c0_24, %c0_25], %41 {strides = array<i32>} : memref<8x32xf32, #tpu.memory_space<vmem>>, vector<8x32xf32>,
    } else {
    }
    %c0 = arith.constant 0 : index
    %c0_1 = arith.constant 0 : index
    %c0_2 = arith.constant 0 : index
    %3 = vector.load %arg1[%c0, %c0_1, %c0_2] : memref<1x8x24xf32, #tpu.memory_space<vmem>>, vector<1x8x24xf32>
    %4 = vector.shape_cast %3 : vector<1x8x24xf32> to vector<8x24xf32>
    %c0_3 = arith.constant 0 : index
    %c0_4 = arith.constant 0 : index
    %5 = vector.load %arg6[%c0_3, %c0_4] : memref<8x32xf32, #tpu.memory_space<vmem>>, vector<8x32xf32>
    %c0_5 = arith.constant 0 : index
    %c0_6 = arith.constant 0 : index
    %6 = vector.load %arg3[%c0_5, %c0_6] : memref<120x128xf32, #tpu.memory_space<vmem>>, vector<24x32xf32>
    %c24 = arith.constant 24 : index
    %c0_7 = arith.constant 0 : index
    %7 = vector.load %arg3[%c24, %c0_7] : memref<120x128xf32, #tpu.memory_space<vmem>>, vector<64x128xf32>
    %c88 = arith.constant 88 : index
    %c0_8 = arith.constant 0 : index
    %8 = vector.load %arg3[%c88, %c0_8] : memref<120x128xf32, #tpu.memory_space<vmem>>, vector<32x128xf32>
    %c0_9 = arith.constant 0 : index
    %c0_10 = arith.constant 0 : index
    %9 = vector.load %arg4[%c0_9, %c0_10] : memref<8x256xf32, #tpu.memory_space<vmem>>, vector<8x128xf32>
    %c0_11 = arith.constant 0 : index
    %c128 = arith.constant 128 : index
    %10 = vector.load %arg4[%c0_11, %c128] : memref<8x256xf32, #tpu.memory_space<vmem>>, vector<8x128xf32>
    %cst = arith.constant dense<0.000000e+00> : vector<8x32xf32>
    %11 = tpu.matmul %4, %6, %cst {dimension_numbers = #tpu.dot_dimension_numbers<[1], [0], [0], [1], [0, 0, 1, 1], [], []>} : vector<8x24xf32>, vector<24x32xf32>, vector<8x32xf32> -> vector<8x32xf32>
    %cst_12 = arith.constant 0.000000e+00 : f32
    %12 = vector.broadcast %cst_12 : f32 to vector<8x32xf32>
    %13 = arith.maximumf %11, %12 : vector<8x32xf32>
    %14 = tpu.concatenate %13, %5 in 1 : vector<8x32xf32>, vector<8x32xf32> -> vector<8x64xf32>
    %cst_13 = arith.constant dense<0.000000e+00> : vector<8x128xf32>
    %15 = tpu.matmul %14, %7, %cst_13 {dimension_numbers = #tpu.dot_dimension_numbers<[1], [0], [0], [1], [0, 0, 1, 1], [], []>} : vector<8x64xf32>, vector<64x128xf32>, vector<8x128xf32> -> vector<8x128xf32>
    %16 = arith.addf %15, %9 : vector<8x128xf32>
    %17 = vector.extract_strided_slice %16 {offsets = [0, 0], sizes = [8, 64], strides = [1, 1]} : vector<8x128xf32> to vector<8x64xf32>
    %18 = arith.negf %17 : vector<8x64xf32>
    %19 = math.exp %18 : vector<8x64xf32>
    %cst_14 = arith.constant 1.000000e+00 : f32
    %20 = vector.broadcast %cst_14 : f32 to vector<8x64xf32>
    %21 = arith.addf %20, %19 : vector<8x64xf32>
    %22 = arith.divf %20, %21 : vector<8x64xf32>
    %23 = vector.extract_strided_slice %22 {offsets = [0, 0], sizes = [8, 32], strides = [1, 1]} : vector<8x64xf32> to vector<8x32xf32>
    %24 = vector.extract_strided_slice %22 {offsets = [0, 32], sizes = [8, 32], strides = [1, 1]} : vector<8x64xf32> to vector<8x32xf32>
    %25 = vector.extract_strided_slice %16 {offsets = [0, 64], sizes = [8, 32], strides = [1, 1]} : vector<8x128xf32> to vector<8x32xf32>
    %26 = vector.extract_strided_slice %16 {offsets = [0, 96], sizes = [8, 32], strides = [1, 1]} : vector<8x128xf32> to vector<8x32xf32>
    %27 = arith.mulf %23, %26 : vector<8x32xf32>
    %28 = arith.addf %25, %27 : vector<8x32xf32>
    %29 = math.tanh %28 : vector<8x32xf32>
    %cst_15 = arith.constant 1.000000e+00 : f32
    %30 = vector.broadcast %cst_15 : f32 to vector<8x32xf32>
    %31 = arith.subf %30, %24 : vector<8x32xf32>
    %32 = arith.mulf %31, %29 : vector<8x32xf32>
    %33 = arith.mulf %24, %5 : vector<8x32xf32>
    %34 = arith.addf %32, %33 : vector<8x32xf32>
    %c0_16 = arith.constant 0 : index
    %c0_17 = arith.constant 0 : index
    %35 = vector.load %arg6[%c0_16, %c0_17] : memref<8x32xf32, #tpu.memory_space<vmem>>, vector<8x32xf32>
    tpu.vector_store %arg6[%c0_16, %c0_17], %34 {strides = array<i32>} : memref<8x32xf32, #tpu.memory_space<vmem>>, vector<8x32xf32>,
    %cst_18 = arith.constant dense<0.000000e+00> : vector<8x128xf32>
    %36 = tpu.matmul %34, %8, %cst_18 {dimension_numbers = #tpu.dot_dimension_numbers<[1], [0], [0], [1], [0, 0, 1, 1], [], []>} : vector<8x32xf32>, vector<32x128xf32>, vector<8x128xf32> -> vector<8x128xf32>
    %37 = arith.addf %36, %10 : vector<8x128xf32>
    %c0_19 = arith.constant 0 : index
    %c0_20 = arith.constant 0 : index
    %c0_21 = arith.constant 0 : index
    %38 = vector.load %arg5[%c0_19, %c0_20, %c0_21] : memref<1x8x128xf32, #tpu.memory_space<vmem>>, vector<1x8x128xf32>
    %39 = vector.shape_cast %38 : vector<1x8x128xf32> to vector<8x128xf32>
    %40 = vector.shape_cast %37 : vector<8x128xf32> to vector<1x8x128xf32>
    tpu.vector_store %arg5[%c0_19, %c0_20, %c0_21], %40 {strides = array<i32>} : memref<1x8x128xf32, #tpu.memory_space<vmem>>, vector<1x8x128xf32>,
    return
  }
  func.func @transform_0(%arg0: i32) -> (i32, i32, i32) {
    %c0_i32 = arith.constant 0 : i32
    %c0_i32_0 = arith.constant 0 : i32
    %c0_i32_1 = arith.constant 0 : i32
    return %arg0, %c0_i32, %c0_i32_0 : i32, i32, i32
  }
  func.func @transform_1(%arg0: i32) -> (i32, i32) {
    %c0_i32 = arith.constant 0 : i32
    %c0_i32_0 = arith.constant 0 : i32
    %c0_i32_1 = arith.constant 0 : i32
    return %c0_i32, %c0_i32_0 : i32, i32
  }
  func.func @transform_2(%arg0: i32) -> (i32, i32) {
    %c0_i32 = arith.constant 0 : i32
    %c0_i32_0 = arith.constant 0 : i32
    %c0_i32_1 = arith.constant 0 : i32
    return %c0_i32, %c0_i32_0 : i32, i32
  }
  func.func @transform_3(%arg0: i32) -> (i32, i32) {
    %c0_i32 = arith.constant 0 : i32
    %c0_i32_0 = arith.constant 0 : i32
    %c0_i32_1 = arith.constant 0 : i32
    return %c0_i32, %c0_i32_0 : i32, i32
  }
  func.func @transform_4(%arg0: i32) -> (i32, i32, i32) {
    %c0_i32 = arith.constant 0 : i32
    %c0_i32_0 = arith.constant 0 : i32
    %c0_i32_1 = arith.constant 0 : i32
    return %arg0, %c0_i32, %c0_i32_0 : i32, i32, i32
  }
}

</mosaic_0001>

<bundles_post_ra>
// kernel: rnn_ppo_agent_rollout.1
= control target key start
LH: loop header
LB: loop body
LE: loop exit
PB: predicated region body
PF: predicated region fallthrough
CT: control target
= control target key end

     0   :  { %9 = vsyncpa [#allocation4], 0  ;;  %s441_s15 = smov [#allocation3]   ;;  %s516_s0 = inlined_call_operand.vmem [shape: f32[1,8,24], index: 0, kind: input, shape index: {}]   ;;  %s517_s1 = inlined_call_operand.vmem [shape: f32[8,32], index: 1, kind: input, shape index: {}]   ;;  %s518_s2 = inlined_call_operand.hbm [shape: f32[120,128], index: 2, kind: input, shape index: {}]   ;;  %s519_s3 = inlined_call_operand.vmem [shape: f32[8,256], index: 3, kind: input, shape index: {}]   ;;  %s520_s4 = inlined_call_operand.vmem [shape: f32[1,8,128], index: 4, kind: output, shape index: {}]  }
   0x1   :  { %s19_s16 = sshll.u32 %s441_s15, 4  ;;  %s417_s19 = scalar_lea.hbm %s518_s2, 1920  ;;  %s20_s16 = int_to_ptr.vmem [resolvable:$true] %s19_s16 }
   0x2   :  { %p418_p0 = scmp.ne.s32.totalorder %s518_s2, %s417_s19  ;;  %p421_p1 = scmp.lt.u32.totalorder %s417_s19, %s518_s2 }
   0x4   :  { %p423_p2 = pnand %p421_p1, %p418_p0 }
   0x6   :  { %426 = shalt.err (!%p423_p2)
}
   0x7   :  { %s427_s24 = scalar_lea.vmem %s20_s16, 1920  ;;  %p432_p4 = scmp.lt.s32.totalorder %s20_s16, %s20_s16 }
   0x8   :  { %p428_p3 = scmp.ne.s32.totalorder %s20_s16, %s427_s24  ;;  %p433_p5 = scmp.lt.s32.totalorder %s427_s24, %s427_s24 }
   0xa   :  { %p434_p6 = por %p433_p5, %p432_p4 }
   0xc   :  { %p435_p7 = pnand %p434_p6, %p428_p3 }
   0xe   :  { %438 = shalt.err (!%p435_p7)
}
   0xf   :  { %s442_s25 = smov 128   ;;  %s443_s26 = smov 8  }
  0x10   :  { %25 = dma.hbm_to_vmem [thread:$0]  %s518_s2, 1920, %s20_s16, [#allocation4], %s442_s25, %s442_s25, %s443_s26  }
  0x11   :  { %439 = dma.done.wait [#allocation4], 1920  }
  0x12   :  { %440 = vsyncadd [#allocation4], 4294965376  ;;  %v444_v0 = vmov 0.0|0.0   ;;  %vm445_vm0 = vmmov 0   ;;  %v446_v1 = vmov 0.0   ;;  %vm36_vm1 = vcmask 261120  }
  0x13   :  { %381 = vmatprep.subr.bf16.mxu0 %v444_v0  ;;  %348 = vmatprep.mubr.msk.f32.mxu0 %vm445_vm0, %v446_v1  ;;  %v40_v2 = vld [vmem:[#allocation3] sm:$0xff]  ;;  %v41_v3 = vld [vmem:[#allocation3 + $0x8] sm:$0xff]  ;;  %v35_v5 = vld [vmem:[%s517_s1] sm:$0xff]  ;;  %vm57_vm2 = vcmask 195584   ;;  %s447_s1 = smov 32   ;;  %vm138_vm3 = vcmask 523264  }
  0x14   :  { %384 = vmatprep.subr.bf16.mxu1 %v444_v0  ;;  %367 = vmatprep.mubr.msk.f32.mxu1 %vm445_vm0, %v446_v1  ;;  %v382_v4 = vpack.c.bf16 %v41_v3, %v40_v2  ;;  %v43_v6 = vld [vmem:[#allocation3 + $0x18] sm:$0xff]  ;;  %37 = vst.msk [vmem:[#allocation2] sm:$0xff] %vm36_vm1, %v35_v5  ;;  %v44_v7 = vld [vmem:[#allocation3 + $0x20] sm:$0xff]  ;;  %v45_v8 = vld [vmem:[#allocation3 + $0x28] sm:$0xff]  ;;  %s448_s7 = smov 64   ;;  %s449_s8 = smov 96  }
  0x15   :  { %v46_v9 = vld [vmem:[#allocation3 + $0x30] sm:$0xff]  ;;  %v385_v10 = vpack.c.bf16 %v44_v7, %v43_v6  ;;  %v38_v12 = vld [vmem:[%s516_s0] sm:$0xff]  ;;  %v48_v15 = vld [vmem:[#allocation3 + $0x40] sm:$0xff] }
  0x16   :  { %383 = vmatpush3.bf16.msra.mxu0 %v382_v4  ;;  %v42_v11 = vld [vmem:[#allocation3 + $0x10] sm:$0xff]  ;;  %v388_v13 = vpack.c.bf16 %v46_v9, %v45_v8  ;;  %v47_v14 = vld [vmem:[#allocation3 + $0x38] sm:$0xff]  ;;  %v49_v18 = vld [vmem:[#allocation3 + $0x48] sm:$0xff] }
  0x17   :  { %346 = vmatprep.subr.mxu0 %v446_v1  ;;  %386 = vmatpush3.bf16.msra.mxu1 %v385_v10  ;;  %v391_v17 = vpack.c.bf16 %v48_v15, %v47_v14  ;;  %v50_v19 = vld [vmem:[#allocation3 + $0x50] sm:$0xff]  ;;  %v55_v26 = vld [vmem:[%s519_s3] sm:$0xff]  ;;  %v52_v39 = vld [vmem:[#allocation3 + $0x60] sm:$0xff] }
  0x18   :  { %387 = vmatprep.subr.bf16.mxu1 %v444_v0  ;;  %v394_v20 = vpack.c.bf16 %v50_v19, %v49_v18  ;;  %v51_v38 = vld [vmem:[#allocation3 + $0x58] sm:$0xff]  ;;  %v53_v40 = vld [vmem:[#allocation3 + $0x68] sm:$0xff]  ;;  %v54_v42 = vld [vmem:[#allocation3 + $0x70] sm:$0xff] }
  0x19   :  { %v397_v41 = vpack.c.bf16 %v52_v39, %v51_v38  ;;  %v400_v43 = vpack.c.bf16 %v54_v42, %v53_v40  ;;  %v56_v51 = vld [vmem:[%s519_s3 + $0x8] sm:$0xff] }
  0x1a   :  { %347 = vmatpush3.msra.mxu0 %v42_v11 }
  0x1b   :  { %349 = vmatmul.mubr.msk.f32.vlgmr.msra.gmra.mrb[0].mxu0 %vm57_vm2, %v38_v12  ;;  %396 = vmatprep.subr.bf16.mxu0 %v444_v0  ;;  %v39_v16 = vld [vmem:[#allocation2] sm:$0xff] }
  0x1c   :  { %389 = vmatpush3.bf16.msra.mxu1 %v388_v13  ;;  %378 = vmatprep.mubr.msk.f32.mxu0 %vm445_vm0, %v446_v1 }
  0x1d   :  { %133 = vrot.lane.b32.xlu0 %v39_v16, %s447_s1  ;;  %390 = vmatprep.subr.bf16.mxu1 %v444_v0 }
  0x1e   :  { %398 = vmatpush3.bf16.msra.mxu0 %v397_v41 }
  0x1f   :  { %399 = vmatprep.subr.bf16.mxu0 %v444_v0 }
  0x20   :  { %392 = vmatpush3.bf16.msra.mxu1 %v391_v17 }
  0x21   :  { %393 = vmatprep.subr.bf16.mxu1 %v444_v0 }
  0x22   :  { %401 = vmatpush3.bf16.msra.mxu0 %v400_v43 }
  0x24   :  { %395 = vmatpush3.bf16.msra.mxu1 %v394_v20 }
  0x8f   :  { %v134_v22 = vpop.permute.xlu0 %133 }
  0xee   :  { %v127_v21 = vpop.f32.mrb[0].mxu0 }
  0xef   :  { %v131_v23 = vmax.f32 %v127_v21, 0.0  ;;  %v350_v24 = vpop.f32.mrb[1].mxu0 }
  0xf1   :  { %v137_v25 = vsel %vm36_vm1, %v131_v23, %v134_v22 }
  0xf2   :  { %368 = vmatmul.mubr.msk.f32.vlgmr.msra.gmra.mrb[0].mxu1 %vm138_vm3, %v137_v25 }
 0x1c5   :  { %v208_v27 = vpop.f32.mrb[0].mxu1 }
 0x1c6   :  { %v209_v28 = vadd.f32 %v208_v27, %v55_v26  ;;  %v369_v29 = vpop.f32.mrb[1].mxu1 }
 0x1c8   :  { %219 = vrot.lane.b32.xlu0 %v209_v28, %s447_s1  ;;  %v322_v30 = vmul.f32 -1.442695, %v209_v28 }
 0x1ca   :  { %411 = vpow2.f32 %v322_v30 }
 0x1d4   :  { %v412_v31 = vpop.eup %411 }
 0x1d5   :  { %v215_v32 = vadd.f32 1.0, %v412_v31 }
 0x1d7   :  { %413 = vrcp.f32 %v215_v32 }
 0x1e1   :  { %v414_v33 = vpop.eup %413 }
 0x1e2   :  { %v229_v45 = vsub.f32 1.0, %v414_v33  ;;  %v235_v47 = vmul.f32 %v414_v33, %v134_v22 }
 0x23a   :  { %v220_v34 = vpop.permute.xlu0 %219 }
 0x23b   :  { %v222_v35 = vmul.f32 %v414_v33, %v220_v34 }
 0x23d   :  { %224 = vrot.lane.b32.xlu1 %v222_v35, %s448_s7 }
 0x2af   :  { %v225_v36 = vpop.permute.xlu1 %224 }
 0x2b0   :  { %v227_v37 = vadd.f32 %v225_v36, %v209_v28 }
 0x2b2   :  { %415 = vtanh.f32 %v227_v37 }
 0x2bc   :  { %v416_v44 = vpop.eup %415 }
 0x2bd   :  { %231 = vrot.lane.b32.xlu1 %v416_v44, %s449_s8 }
 0x32f   :  { %v232_v46 = vpop.permute.xlu1 %231 }
 0x330   :  { %v234_v48 = vmul.f32 %v232_v46, %v229_v45 }
 0x332   :  { %v236_v49 = vadd.f32 %v235_v47, %v234_v48 }
 0x334   :  { %238 = vrot.lane.b32.xlu0 %v236_v49, %s449_s8 }
 0x3a6   :  { %v239_v50 = vpop.permute.xlu0 %238 }
 0x3a7   :  { %241 = vst.msk [vmem:[#allocation2] sm:$0xff] %vm36_vm1, %v239_v50  ;;  %379 = vmatmul.mubr.msk.f32.vlgmr.msra.gmra.mrb[2].mxu0 %vm36_vm1, %v239_v50 }
 0x47a   :  { %v310_v52 = vpop.f32.mrb[2].mxu0 }
 0x47b   :  { %v311_v53 = vadd.f32 %v310_v52, %v56_v51  ;;  %v380_v54 = vpop.f32.mrb[3].mxu0 }
 0x47d   :  { %314 = vst [vmem:[%s520_s4] sm:$0xff] %v311_v53 }
 0x47e   :  { %319 = vsyncpa [#allocation4], 1 }

</bundles_post_ra>
